<compile_context>
chip_gen: v7x
topology: tpu7x:2x2x1
jax: 0.10.0
libtpu: 0.0.40
codegen_flags: <defaults>
</compile_context>

<pallas_src>
import math
import numpy as np
import jax
import jax.numpy as jnp
from jax.experimental import pallas as pl
from jax.experimental.pallas import tpu as pltpu

D1 = 4 * 1 + 4 * 3       # 16  = dim(Rs_in1)
D2 = 2 * 1 + 2 * 3       # 8   = dim(Rs_in2)
DOUT = 8 * 1 + 8 * 3     # 32  = dim(Rs_out)
KDIM = D1 * D2           # 128 = kron contraction width (fills the MXU / lanes)
NWEIGHT = 5 * 4 * 2 * 8  # 320 (five uvw paths, each mul1*mul2*mul_out = 4*2*8)
PACK = 4                 # batch rows packed per kernel row -> 128-lane dense output

# Static 0/1 expansion matrices (block-diagonal over the PACK packing):
#   E1[a, a*8+b] = 1  -> (x1 @ E1)[c = a*8+b] = x1[a]
#   E2[b, a*8+b] = 1  -> (x2 @ E2)[c = a*8+b] = x2[b]
_E1 = np.repeat(np.eye(D1, dtype=np.float32), D2, axis=1)        # (16, 128)
_E2 = np.tile(np.eye(D2, dtype=np.float32), (1, D1))             # (8, 128)
_E1BD = np.kron(np.eye(PACK, dtype=np.float32), _E1)             # (64, 512)
_E2BD = np.kron(np.eye(PACK, dtype=np.float32), _E2)             # (32, 512)


def _levi_civita():
    eps = np.zeros((3, 3, 3), dtype=np.float32)
    eps[0, 1, 2] = eps[1, 2, 0] = eps[2, 0, 1] = 1.0
    eps[0, 2, 1] = eps[2, 1, 0] = eps[1, 0, 2] = -1.0
    return jnp.asarray(eps)


def build_bilinear_operator(w):
    """Fold weights + specialized-path wigner factors into T[a, b, o] (D1, D2, DOUT)."""
    W1 = w[0:64].reshape(4, 2, 8)                      # (0,0,0) uvw
    W2 = w[64:128].reshape(4, 2, 8)                    # (0,1,1) uvw
    W3 = w[128:192].reshape(4, 2, 8)                   # (1,0,1) uvw
    W4 = w[192:256].reshape(4, 2, 8) / math.sqrt(3.0)  # (1,1,0) uvw
    W5 = w[256:320].reshape(4, 2, 8) / math.sqrt(2.0)  # (1,1,1) uvw (cross product)
    eye3 = jnp.eye(3, dtype=w.dtype)
    eps = _levi_civita().astype(w.dtype)

    T = jnp.zeros((D1, D2, DOUT), dtype=w.dtype)
    # out0[w] += W1[u,v,w] * x1_0[u] * x2_0[v]
    T = T.at[0:4, 0:2, 0:8].add(W1)
    # out1[w,i] += W2[u,v,w] * x1_0[u] * x2_1[v,i]
    T = T.at[0:4, 2:8, 8:32].add(jnp.einsum('uvw,ij->uviwj', W2, eye3).reshape(4, 6, 24))
    # out1[w,i] += W3[u,v,w] * x1_1[u,i] * x2_0[v]
    T = T.at[4:16, 0:2, 8:32].add(jnp.einsum('uvw,ij->uivwj', W3, eye3).reshape(12, 2, 24))
    # out0[w] += (W4[u,v,w]/sqrt(3)) * x1_1[u,i] * x2_1[v,i]
    T = T.at[4:16, 2:8, 0:8].add(jnp.einsum('uvw,ij->uivjw', W4, eye3).reshape(12, 6, 8))
    # out1[w,k] += (W5[u,v,w]/sqrt(2)) * eps[k,i,j] * x1_1[u,i] * x2_1[v,j]
    T = T.at[4:16, 2:8, 8:32].add(jnp.einsum('uvw,kij->uivjwk', W5, eps).reshape(12, 6, 24))
    return T


def normalization_scale():
    # count per output slot: l=0 block -> 16 paths, l=1 block -> 24 paths
    scale = np.concatenate([np.full(8, 1.0 / math.sqrt(16.0), np.float32),
                            np.full(24, 1.0 / math.sqrt(24.0), np.float32)])
    return jnp.asarray(scale).reshape(1, DOUT)


def tp_kernel(x1_ref, x2_ref, e1_ref, e2_ref, t_ref, o_ref):
    # x1: (TB, 64)  x2: (TB, 32)  e1: (64, 512)  e2: (32, 512)  t: (512, 128)
    # o : (TB, 128) — 4 batch items packed per row, all lane-dense.
    s1 = jnp.dot(x1_ref[...], e1_ref[...], preferred_element_type=jnp.float32)
    s2 = jnp.dot(x2_ref[...], e2_ref[...], preferred_element_type=jnp.float32)
    o_ref[...] = jnp.dot(s1 * s2, t_ref[...],
                         preferred_element_type=jnp.float32).astype(o_ref.dtype)


def _round_up(x, m):
    return ((x + m - 1) // m) * m


def custom_weighted_tensor_product(x1, x2, weight, *, tile_b=1024):
    """x1 [..., 16], x2 [..., 8] -> out [..., 32]. tile_b = packed rows per grid step."""
    size = x1.shape[:-1]
    assert x1.shape[-1] == D1 and x2.shape[-1] == D2 and x2.shape[:-1] == size
    z = int(np.prod(size)) if size else 1
    out_dtype = x1.dtype

    x1f = x1.reshape(z, D1)     # no dtype cast: bf16/f32 inputs flow through natively
    x2f = x2.reshape(z, D2)

    # Pack PACK batch rows per kernel row (free row-major views). Only pad when the
    # batch is not a multiple of PACK (pad materializes a copy — avoided otherwise).
    if z % PACK:
        pad = PACK - z % PACK
        x1f = jnp.pad(x1f, ((0, pad), (0, 0)))
        x2f = jnp.pad(x2f, ((0, pad), (0, 0)))
    zp = x1f.shape[0]
    zr = zp // PACK
    x1p = x1f.reshape(zr, PACK * D1)   # (zr, 64)
    x2p = x2f.reshape(zr, PACK * D2)   # (zr, 32)

    # Parameter setup (plain-JAX glue): fold weights + wigner factors + the per-segment
    # normalization into one (128, 32) operator, then block-diagonal for the packing.
    T = build_bilinear_operator(weight.astype(jnp.float32))
    tflat = T.reshape(KDIM, DOUT) * normalization_scale()          # scale folded in
    tbd = jnp.kron(jnp.eye(PACK, dtype=jnp.float32), tflat)        # (512, 128)
    e1bd = jnp.asarray(_E1BD)                                      # (64, 512)
    e2bd = jnp.asarray(_E2BD)                                      # (32, 512)

    tb = min(int(tile_b), _round_up(zr, 8))   # large tiles; multiple of 8 sublanes
    grid = pl.cdiv(zr, tb)                    # ragged last block: Pallas masks writeback

    outp = pl.pallas_call(
        tp_kernel,
        out_shape=jax.ShapeDtypeStruct((zr, PACK * DOUT), out_dtype),
        grid_spec=pltpu.PrefetchScalarGridSpec(
            num_scalar_prefetch=0,
            grid=(grid,),
            in_specs=[
                pl.BlockSpec((tb, PACK * D1), lambda i: (i, 0)),
                pl.BlockSpec((tb, PACK * D2), lambda i: (i, 0)),
                pl.BlockSpec((PACK * D1, PACK * KDIM), lambda i: (0, 0)),
                pl.BlockSpec((PACK * D2, PACK * KDIM), lambda i: (0, 0)),
                pl.BlockSpec((PACK * KDIM, PACK * DOUT), lambda i: (0, 0)),
            ],
            out_specs=pl.BlockSpec((tb, PACK * DOUT), lambda i: (i, 0)),
        ),
        compiler_params=pltpu.CompilerParams(
            dimension_semantics=("parallel",),        # shard grid across TCs (v7x)
            vmem_limit_bytes=40 * 1024 * 1024,        # headroom; safe on v5e/v6e/v7x
        ),
    )(x1p, x2p, e1bd, e2bd, tbd)

    out = outp.reshape(zp, DOUT)
    if zp != z:
        out = out[:z]
    return out.reshape(*size, DOUT)


def reference(x1, x2, w):
    """Literal JAX transcription of the torch-generated specialized code."""
    B = x1.shape[0]
    x1_0 = x1[:, 0:4]
    x1_1 = x1[:, 4:16].reshape(B, 4, 3)
    x2_0 = x2[:, 0:2]
    x2_1 = x2[:, 2:8].reshape(B, 2, 3)
    out = jnp.zeros((B, DOUT), jnp.float32)
    W1 = w[0:64].reshape(4, 2, 8)
    out = out.at[:, 0:8].add(jnp.einsum('uvw,zu,zv->zw', W1, x1_0, x2_0))
    W2 = w[64:128].reshape(4, 2, 8)
    out = out.at[:, 8:32].add(jnp.einsum('uvw,zu,zvi->zwi', W2, x1_0, x2_1).reshape(B, 24))
    W3 = w[128:192].reshape(4, 2, 8)
    out = out.at[:, 8:32].add(jnp.einsum('uvw,zui,zv->zwi', W3, x1_1, x2_0).reshape(B, 24))
    W4 = w[192:256].reshape(4, 2, 8) / math.sqrt(3.0)
    out = out.at[:, 0:8].add(jnp.einsum('uvw,zui,zvi->zw', W4, x1_1, x2_1))
    W5 = w[256:320].reshape(4, 2, 8) / math.sqrt(2.0)
    s1 = jnp.broadcast_to(x1_1[:, :, None, :], (B, 4, 2, 3))
    s2 = jnp.broadcast_to(x2_1[:, None, :, :], (B, 4, 2, 3))
    cr = jnp.cross(s1, s2, axis=3)
    out = out.at[:, 8:32].add(jnp.einsum('uvw,zuvi->zwi', W5, cr).reshape(B, 24))
    out = out.at[:, 0:8].multiply(1.0 / math.sqrt(16.0))
    out = out.at[:, 8:32].multiply(1.0 / math.sqrt(24.0))
    return out


if __name__ == "__main__":
    key = jax.random.PRNGKey(0)
    k1, k2, kw = jax.random.split(key, 3)
    x1 = jax.random.normal(k1, (2, 16, D1), dtype=jnp.float32)
    x2 = jax.random.normal(k2, (2, 16, D2), dtype=jnp.float32)
    weight = jax.random.normal(kw, (NWEIGHT,), dtype=jnp.float32)  # torch.randn(nweight)

    out = custom_weighted_tensor_product(x1, x2, weight)
    out = jax.block_until_ready(out)

    ref = reference(x1.reshape(-1, D1), x2.reshape(-1, D2), weight).reshape(2, 16, DOUT)
    assert out.shape == (2, 16, DOUT)
    np.testing.assert_allclose(np.asarray(out), np.asarray(ref), rtol=1e-5, atol=1e-5)
    print("KERNEL_OK")
</pallas_src>

<mosaic_0001>
module attributes {stable_mosaic.version = 11 : i64} {
  func.func @tp_kernel(%arg0: i32, %arg1: memref<8x64xf32, #tpu.memory_space<vmem>>, %arg2: memref<8x32xf32, #tpu.memory_space<vmem>>, %arg3: memref<64x512xf32, #tpu.memory_space<vmem>>, %arg4: memref<32x512xf32, #tpu.memory_space<vmem>>, %arg5: memref<512x128xf32, #tpu.memory_space<vmem>>, %arg6: memref<8x128xf32, #tpu.memory_space<vmem>>) attributes {dimension_semantics = [#tpu.dimension_semantics<parallel>], iteration_bounds = array<i64: 1>, scalar_prefetch = 0 : i64, scratch_operands = 0 : i64, tpu.core_type = #tpu.core_type<tc>, window_params = [{transform_indices = @transform_0, window_bounds = array<i64: 8, 64>}, {transform_indices = @transform_1, window_bounds = array<i64: 8, 32>}, {pipeline_mode = #tpu.pipeline_mode<synchronous>, transform_indices = @transform_2, window_bounds = array<i64: 64, 512>}, {pipeline_mode = #tpu.pipeline_mode<synchronous>, transform_indices = @transform_3, window_bounds = array<i64: 32, 512>}, {pipeline_mode = #tpu.pipeline_mode<synchronous>, transform_indices = @transform_4, window_bounds = array<i64: 512, 128>}, {transform_indices = @transform_5, window_bounds = array<i64: 8, 128>}]} {
    %c0 = arith.constant 0 : index
    %c0_0 = arith.constant 0 : index
    %0 = vector.load %arg1[%c0, %c0_0] : memref<8x64xf32, #tpu.memory_space<vmem>>, vector<8x64xf32>
    %c0_1 = arith.constant 0 : index
    %c0_2 = arith.constant 0 : index
    %1 = vector.load %arg3[%c0_1, %c0_2] : memref<64x512xf32, #tpu.memory_space<vmem>>, vector<64x512xf32>
    %cst = arith.constant dense<0.000000e+00> : vector<8x512xf32>
    %2 = tpu.matmul %0, %1, %cst {dimension_numbers = #tpu.dot_dimension_numbers<[1], [0], [0], [1], [0, 0, 1, 1], [], []>} : vector<8x64xf32>, vector<64x512xf32>, vector<8x512xf32> -> vector<8x512xf32>
    %c0_3 = arith.constant 0 : index
    %c0_4 = arith.constant 0 : index
    %3 = vector.load %arg2[%c0_3, %c0_4] : memref<8x32xf32, #tpu.memory_space<vmem>>, vector<8x32xf32>
    %c0_5 = arith.constant 0 : index
    %c0_6 = arith.constant 0 : index
    %4 = vector.load %arg4[%c0_5, %c0_6] : memref<32x512xf32, #tpu.memory_space<vmem>>, vector<32x512xf32>
    %cst_7 = arith.constant dense<0.000000e+00> : vector<8x512xf32>
    %5 = tpu.matmul %3, %4, %cst_7 {dimension_numbers = #tpu.dot_dimension_numbers<[1], [0], [0], [1], [0, 0, 1, 1], [], []>} : vector<8x32xf32>, vector<32x512xf32>, vector<8x512xf32> -> vector<8x512xf32>
    %6 = arith.mulf %2, %5 : vector<8x512xf32>
    %c0_8 = arith.constant 0 : index
    %c0_9 = arith.constant 0 : index
    %7 = vector.load %arg5[%c0_8, %c0_9] : memref<512x128xf32, #tpu.memory_space<vmem>>, vector<512x128xf32>
    %cst_10 = arith.constant dense<0.000000e+00> : vector<8x128xf32>
    %8 = tpu.matmul %6, %7, %cst_10 {dimension_numbers = #tpu.dot_dimension_numbers<[1], [0], [0], [1], [0, 0, 1, 1], [], []>} : vector<8x512xf32>, vector<512x128xf32>, vector<8x128xf32> -> vector<8x128xf32>
    %c0_11 = arith.constant 0 : index
    %c0_12 = arith.constant 0 : index
    %9 = vector.load %arg6[%c0_11, %c0_12] : memref<8x128xf32, #tpu.memory_space<vmem>>, vector<8x128xf32>
    tpu.vector_store %arg6[%c0_11, %c0_12], %8 {strides = array<i32>} : memref<8x128xf32, #tpu.memory_space<vmem>>, vector<8x128xf32>,
    return
  }
  func.func @transform_0(%arg0: i32) -> (i32, i32) {
    %c0_i32 = arith.constant 0 : i32
    %c0_i32_0 = arith.constant 0 : i32
    return %arg0, %c0_i32 : i32, i32
  }
  func.func @transform_1(%arg0: i32) -> (i32, i32) {
    %c0_i32 = arith.constant 0 : i32
    %c0_i32_0 = arith.constant 0 : i32
    return %arg0, %c0_i32 : i32, i32
  }
  func.func @transform_2(%arg0: i32) -> (i32, i32) {
    %c0_i32 = arith.constant 0 : i32
    %c0_i32_0 = arith.constant 0 : i32
    %c0_i32_1 = arith.constant 0 : i32
    return %c0_i32, %c0_i32_0 : i32, i32
  }
  func.func @transform_3(%arg0: i32) -> (i32, i32) {
    %c0_i32 = arith.constant 0 : i32
    %c0_i32_0 = arith.constant 0 : i32
    %c0_i32_1 = arith.constant 0 : i32
    return %c0_i32, %c0_i32_0 : i32, i32
  }
  func.func @transform_4(%arg0: i32) -> (i32, i32) {
    %c0_i32 = arith.constant 0 : i32
    %c0_i32_0 = arith.constant 0 : i32
    %c0_i32_1 = arith.constant 0 : i32
    return %c0_i32, %c0_i32_0 : i32, i32
  }
  func.func @transform_5(%arg0: i32) -> (i32, i32) {
    %c0_i32 = arith.constant 0 : i32
    %c0_i32_0 = arith.constant 0 : i32
    return %arg0, %c0_i32 : i32, i32
  }
}

</mosaic_0001>

<bundles_post_ra>
// kernel: tpu_custom_call.1
= control target key start
LH: loop header
LB: loop body
LE: loop exit
PB: predicated region body
PF: predicated region fallthrough
CT: control target
= control target key end

     0   :  { %10 = vsyncpa [#allocation3], 0  ;;  %s1117_s0 = inlined_call_operand.hbm [shape: f32[8,64], index: 0, kind: input, shape index: {}]   ;;  %s1118_s1 = inlined_call_operand.hbm [shape: f32[8,32], index: 1, kind: input, shape index: {}]   ;;  %s1119_s2 = inlined_call_operand.hbm [shape: f32[64,512], index: 2, kind: input, shape index: {}]   ;;  %s1120_s3 = inlined_call_operand.hbm [shape: f32[32,512], index: 3, kind: input, shape index: {}]   ;;  %s1121_s4 = inlined_call_operand.hbm [shape: f32[512,128], index: 4, kind: input, shape index: {}]   ;;  %s1122_s5 = inlined_call_operand.hbm [shape: f32[8,128], index: 5, kind: output, shape index: {}]  }
   0x1   :  { %11 = vsyncpa [#allocation6], 0 }
   0x2   :  { %12 = vsyncpa [#allocation9], 0 }
   0x3   :  { %13 = vsyncpa [#allocation4], 0  ;;  %s990_s18 = smov [#allocation5]   ;;  %s850_s22 = scalar_lea.hbm %s1118_s1, 128 }
   0x4   :  { %s30_s19 = sshll.u32 %s990_s18, 4  ;;  %p851_p0 = scmp.ne.s32.totalorder %s1118_s1, %s850_s22  ;;  %s31_s19 = int_to_ptr.vmem [resolvable:$true] %s30_s19 }
   0x5   :  { %p854_p1 = scmp.lt.u32.totalorder %s850_s22, %s1118_s1 }
   0x7   :  { %p856_p2 = pnand %p854_p1, %p851_p0 }
   0x9   :  { %859 = shalt.err (!%p856_p2)
}
   0xa   :  { %s860_s27 = scalar_lea.vmem %s31_s19, 128  ;;  %p865_p4 = scmp.lt.s32.totalorder %s31_s19, %s31_s19 }
   0xb   :  { %p861_p3 = scmp.ne.s32.totalorder %s31_s19, %s860_s27  ;;  %p866_p5 = scmp.lt.s32.totalorder %s860_s27, %s860_s27 }
   0xd   :  { %p867_p6 = por %p866_p5, %p865_p4 }
   0xf   :  { %p868_p7 = pnand %p867_p6, %p861_p3 }
  0x11   :  { %871 = shalt.err (!%p868_p7)
}
  0x12   :  { %33 = dma.hbm_to_vmem [thread:$0]  %s1118_s1, 128, %s31_s19, [#allocation6]  }
  0x13   :  { %s991_s30 = smov [#allocation8]   ;;  %s992_s7 = smov [#allocation2]  }
  0x14   :  { %s51_s6 = sshll.u32 %s991_s30, 4  ;;  %s20_s8 = sshll.u32 %s992_s7, 4  ;;  %s52_s6 = int_to_ptr.vmem [resolvable:$true] %s51_s6  ;;  %s21_s8 = int_to_ptr.vmem [resolvable:$true] %s20_s8 }
  0x15   :  { %s872_s11 = scalar_lea.hbm %s1120_s3, 2048 }
  0x16   :  { %p873_p8 = scmp.ne.s32.totalorder %s1120_s3, %s872_s11  ;;  %p876_p9 = scmp.lt.u32.totalorder %s872_s11, %s1120_s3 }
  0x18   :  { %p878_p10 = pnand %p876_p9, %p873_p8 }
  0x1a   :  { %881 = shalt.err (!%p878_p10)
}
  0x1b   :  { %s882_s1 = scalar_lea.vmem %s52_s6, 2048  ;;  %p887_p12 = scmp.lt.s32.totalorder %s52_s6, %s52_s6 }
  0x1c   :  { %p883_p11 = scmp.ne.s32.totalorder %s52_s6, %s882_s1  ;;  %p888_p13 = scmp.lt.s32.totalorder %s882_s1, %s882_s1 }
  0x1e   :  { %p889_p0 = por %p888_p13, %p887_p12 }
  0x20   :  { %p890_p1 = pnand %p889_p0, %p883_p11 }
  0x22   :  { %893 = shalt.err (!%p890_p1)
}
  0x23   :  { %s993_s16 = smov 512   ;;  %s994_s17 = smov 32  }
  0x24   :  { %57 = dma.hbm_to_vmem [thread:$0]  %s1120_s3, 2048, %s52_s6, [#allocation9], %s993_s16, %s993_s16, %s994_s17  }
  0x25   :  { %s894_s22 = scalar_lea.hbm %s1117_s0, 128 }
  0x26   :  { %p895_p2 = scmp.ne.s32.totalorder %s1117_s0, %s894_s22  ;;  %p898_p3 = scmp.lt.u32.totalorder %s894_s22, %s1117_s0 }
  0x28   :  { %p900_p4 = pnand %p898_p3, %p895_p2 }
  0x2a   :  { %903 = shalt.err (!%p900_p4)
}
  0x2b   :  { %s904_s27 = scalar_lea.vmem %s21_s8, 128  ;;  %p909_p6 = scmp.lt.s32.totalorder %s21_s8, %s21_s8 }
  0x2c   :  { %p905_p5 = scmp.ne.s32.totalorder %s21_s8, %s904_s27  ;;  %p910_p7 = scmp.lt.s32.totalorder %s904_s27, %s904_s27 }
  0x2e   :  { %p911_p8 = por %p910_p7, %p909_p6 }
  0x30   :  { %p912_p9 = pnand %p911_p8, %p905_p5 }
  0x32   :  { %915 = shalt.err (!%p912_p9)
}
  0x33   :  { %23 = dma.hbm_to_vmem [thread:$0]  %s1117_s0, 128, %s21_s8, [#allocation3]  }
  0x34   :  { %s995_s29 = smov [#allocation7]   ;;  %s996_s6 = smov [#allocation10]  }
  0x35   :  { %s39_s30 = sshll.u32 %s995_s29, 4  ;;  %s63_s7 = sshll.u32 %s996_s6, 4  ;;  %s40_s30 = int_to_ptr.vmem [resolvable:$true] %s39_s30  ;;  %s64_s7 = int_to_ptr.vmem [resolvable:$true] %s63_s7 }
  0x36   :  { %s916_s11 = scalar_lea.hbm %s1119_s2, 4096 }
  0x37   :  { %p917_p10 = scmp.ne.s32.totalorder %s1119_s2, %s916_s11  ;;  %p920_p11 = scmp.lt.u32.totalorder %s916_s11, %s1119_s2 }
  0x39   :  { %p922_p12 = pnand %p920_p11, %p917_p10 }
  0x3b   :  { %925 = shalt.err (!%p922_p12)
}
  0x3c   :  { %s926_s0 = scalar_lea.vmem %s40_s30, 4096  ;;  %p931_p0 = scmp.lt.s32.totalorder %s40_s30, %s40_s30 }
  0x3d   :  { %p927_p13 = scmp.ne.s32.totalorder %s40_s30, %s926_s0  ;;  %p932_p1 = scmp.lt.s32.totalorder %s926_s0, %s926_s0 }
  0x3f   :  { %p933_p2 = por %p932_p1, %p931_p0 }
  0x41   :  { %p934_p3 = pnand %p933_p2, %p927_p13 }
  0x43   :  { %937 = shalt.err (!%p934_p3)
}
  0x44   :  { %45 = dma.hbm_to_vmem [thread:$0]  %s1119_s2, 4096, %s40_s30, [#allocation6], %s993_s16, %s993_s16, %s994_s17  }
  0x45   :  { %s938_s20 = scalar_lea.hbm %s1121_s4, 8192 }
  0x46   :  { %p939_p4 = scmp.ne.s32.totalorder %s1121_s4, %s938_s20  ;;  %p942_p5 = scmp.lt.u32.totalorder %s938_s20, %s1121_s4 }
  0x48   :  { %p944_p6 = pnand %p942_p5, %p939_p4 }
  0x4a   :  { %947 = shalt.err (!%p944_p6)
}
  0x4b   :  { %s948_s25 = scalar_lea.vmem %s64_s7, 8192  ;;  %p953_p8 = scmp.lt.s32.totalorder %s64_s7, %s64_s7 }
  0x4c   :  { %p949_p7 = scmp.ne.s32.totalorder %s64_s7, %s948_s25  ;;  %p954_p9 = scmp.lt.s32.totalorder %s948_s25, %s948_s25 }
  0x4e   :  { %p955_p10 = por %p954_p9, %p953_p8 }
  0x50   :  { %p956_p11 = pnand %p955_p10, %p949_p7 }
  0x52   :  { %959 = shalt.err (!%p956_p11)
}
  0x53   :  { %s997_s2 = smov 128   ;;  %s998_s16 = smov 8  }
  0x54   :  { %69 = dma.hbm_to_vmem [thread:$0]  %s1121_s4, 8192, %s64_s7, [#allocation9], %s997_s2, %s997_s2, %s998_s16  }
  0x55   :  { %982 = dma.done.wait [#allocation3], 128  }
  0x56   :  { %983 = vsyncadd [#allocation3], 4294967168 }
  0x57   :  { %984 = dma.done.wait [#allocation6], 4224  }
  0x58   :  { %985 = vsyncadd [#allocation6], 4294963072 }
  0x59   :  { %986 = dma.done.wait [#allocation9], 10240  }
  0x5a   :  { %987 = vsyncadd [#allocation9], 4294957056  ;;  %v999_v0 = vmov 0.0   ;;  %v87_v1 = vld [vmem:[#allocation7 + $0x8] sm:$0xff]  ;;  %v89_v3 = vld [vmem:[#allocation7 + $0x18] sm:$0xff]  ;;  %vm118_vm0 = vcmask 523264  }
  0x5b   :  { %186 = vmatprep.mubr.f32.mxu0 %v999_v0  ;;  %257 = vmatprep.mubr.f32.mxu1 %v999_v0  ;;  %v91_v2 = vld [vmem:[#allocation7 + $0x28] sm:$0xff]  ;;  %v93_v5 = vld [vmem:[#allocation7 + $0x38] sm:$0xff]  ;;  %v86_v6 = vld [vmem:[#allocation7] sm:$0xff]  ;;  %vm281_vm1 = vcmask 261120   ;;  %s1000_s4 = smov [#allocation11]  }
  0x5c   :  { %v727_v4 = vpack.c.bf16 %v91_v2, %v87_v1  ;;  %v90_v7 = vld [vmem:[#allocation7 + $0x20] sm:$0xff]  ;;  %v743_v8 = vpack.c.bf16 %v93_v5, %v89_v3  ;;  %v88_v10 = vld [vmem:[#allocation7 + $0x10] sm:$0xff]  ;;  %v95_v12 = vld [vmem:[#allocation7 + $0x48] sm:$0xff]  ;;  %s642_s27 = sshll.u32 %s1000_s4, 4  ;;  %s643_s27 = int_to_ptr.vmem [resolvable:$true] %s642_s27 }
  0x5d   :  { %v729_v9 = vpack.c.bf16 %v90_v7, %v86_v6  ;;  %v92_v11 = vld [vmem:[#allocation7 + $0x30] sm:$0xff]  ;;  %v99_v14 = vld [vmem:[#allocation7 + $0x68] sm:$0xff]  ;;  %v97_v15 = vld [vmem:[#allocation7 + $0x58] sm:$0xff]  ;;  %s960_s3 = scalar_lea.vmem %s643_s27, 128  ;;  %p965_p13 = scmp.lt.s32.totalorder %s643_s27, %s643_s27 }
  0x5e   :  { %728 = vmatprep.subr.bf16.mxu0 %v727_v4  ;;  %v745_v13 = vpack.c.bf16 %v92_v11, %v88_v10  ;;  %v101_v16 = vld [vmem:[#allocation7 + $0x78] sm:$0xff]  ;;  %744 = vmatprep.subr.bf16.mxu1 %v743_v8  ;;  %v731_v17 = vpack.c.bf16 %v99_v14, %v95_v12  ;;  %v94_v19 = vld [vmem:[#allocation7 + $0x40] sm:$0xff]  ;;  %v96_v21 = vld [vmem:[#allocation7 + $0x50] sm:$0xff]  ;;  %p961_p12 = scmp.ne.s32.totalorder %s643_s27, %s960_s3  ;;  %p966_p0 = scmp.lt.s32.totalorder %s960_s3, %s960_s3 }
  0x5f   :  { %730 = vmatpush1.bf16.msra.mxu0 %v729_v9  ;;  %v747_v18 = vpack.c.bf16 %v101_v16, %v97_v15  ;;  %v98_v20 = vld [vmem:[#allocation7 + $0x60] sm:$0xff]  ;;  %v100_v23 = vld [vmem:[#allocation7 + $0x70] sm:$0xff]  ;;  %v103_v24 = vld [vmem:[#allocation7 + $0x88] sm:$0xff] }
  0x60   :  { %746 = vmatpush1.bf16.msra.mxu1 %v745_v13  ;;  %v733_v22 = vpack.c.bf16 %v98_v20, %v94_v19  ;;  %v107_v25 = vld [vmem:[#allocation7 + $0xa8] sm:$0xff]  ;;  %732 = vmatprep.subr.bf16.mxu0 %v731_v17  ;;  %v749_v26 = vpack.c.bf16 %v100_v23, %v96_v21  ;;  %v105_v28 = vld [vmem:[#allocation7 + $0x98] sm:$0xff]  ;;  %v102_v30 = vld [vmem:[#allocation7 + $0x80] sm:$0xff]  ;;  %p967_p1 = por %p966_p0, %p965_p13 }
  0x61   :  { %748 = vmatprep.subr.bf16.mxu1 %v747_v18  ;;  %v735_v27 = vpack.c.bf16 %v107_v25, %v103_v24  ;;  %v109_v29 = vld [vmem:[#allocation7 + $0xb8] sm:$0xff]  ;;  %v106_v32 = vld [vmem:[#allocation7 + $0xa0] sm:$0xff]  ;;  %v104_v33 = vld [vmem:[#allocation7 + $0x90] sm:$0xff] }
  0x62   :  { %v751_v31 = vpack.c.bf16 %v109_v29, %v105_v28  ;;  %v108_v34 = vld [vmem:[#allocation7 + $0xb0] sm:$0xff]  ;;  %v737_v35 = vpack.c.bf16 %v106_v32, %v102_v30  ;;  %v111_v36 = vld [vmem:[#allocation7 + $0xc8] sm:$0xff]  ;;  %v113_v38 = vld [vmem:[#allocation7 + $0xd8] sm:$0xff]  ;;  %p968_p2 = pnand %p967_p1, %p961_p12 }
  0x63   :  { %734 = vmatpush1.bf16.msra.mxu0 %v733_v22  ;;  %v115_v37 = vld [vmem:[#allocation7 + $0xe8] sm:$0xff]  ;;  %v753_v39 = vpack.c.bf16 %v108_v34, %v104_v33  ;;  %v117_v41 = vld [vmem:[#allocation7 + $0xf8] sm:$0xff]  ;;  %v110_v42 = vld [vmem:[#allocation7 + $0xc0] sm:$0xff] }
  0x64   :  { %750 = vmatpush1.bf16.msra.mxu1 %v749_v26  ;;  %736 = vmatprep.subr.bf16.mxu0 %v735_v27  ;;  %v739_v40 = vpack.c.bf16 %v115_v37, %v111_v36  ;;  %v114_v43 = vld [vmem:[#allocation7 + $0xe0] sm:$0xff]  ;;  %v755_v44 = vpack.c.bf16 %v117_v41, %v113_v38  ;;  %v112_v45 = vld [vmem:[#allocation7 + $0xd0] sm:$0xff]  ;;  %v266_v47 = vld [vmem:[#allocation8 + $0x8] sm:$0xff] }
  0x65   :  { %752 = vmatprep.subr.bf16.mxu1 %v751_v31  ;;  %v116_v46 = vld [vmem:[#allocation7 + $0xf0] sm:$0xff]  ;;  %v270_v48 = vld [vmem:[#allocation8 + $0x28] sm:$0xff]  ;;  %v268_v49 = vld [vmem:[#allocation8 + $0x18] sm:$0xff]  ;;  %v741_v50 = vpack.c.bf16 %v114_v43, %v110_v42 }
  0x66   :  { %v272_v51 = vld [vmem:[#allocation8 + $0x38] sm:$0xff]  ;;  %v757_v52 = vpack.c.bf16 %v116_v46, %v112_v45  ;;  %v759_v53 = vpack.c.bf16 %v270_v48, %v266_v47  ;;  %v265_v54 = vld [vmem:[#allocation8] sm:$0xff]  ;;  %v267_v56 = vld [vmem:[#allocation8 + $0x10] sm:$0xff] }
  0x67   :  { %738 = vmatpush1.bf16.msra.mxu0 %v737_v35  ;;  %v269_v55 = vld [vmem:[#allocation8 + $0x20] sm:$0xff]  ;;  %v767_v57 = vpack.c.bf16 %v272_v51, %v268_v49  ;;  %v271_v58 = vld [vmem:[#allocation8 + $0x30] sm:$0xff]  ;;  %v274_v59 = vld [vmem:[#allocation8 + $0x48] sm:$0xff] }
  0x68   :  { %754 = vmatpush1.bf16.msra.mxu1 %v753_v39  ;;  %740 = vmatprep.subr.bf16.mxu0 %v739_v40  ;;  %v278_v60 = vld [vmem:[#allocation8 + $0x68] sm:$0xff]  ;;  %v276_v61 = vld [vmem:[#allocation8 + $0x58] sm:$0xff]  ;;  %v85_v63 = vld [vmem:[#allocation2] sm:$0xff]  ;;  %v761_v1 = vpack.c.bf16 %v269_v55, %v265_v54  ;;  %v769_v2 = vpack.c.bf16 %v271_v58, %v267_v56 }
  0x69   :  { %756 = vmatprep.subr.bf16.mxu1 %v755_v44  ;;  %v280_v62 = vld [vmem:[#allocation8 + $0x78] sm:$0xff]  ;;  %v763_v3 = vpack.c.bf16 %v278_v60, %v274_v59  ;;  %v273_v4 = vld [vmem:[#allocation8 + $0x40] sm:$0xff]  ;;  %v275_v6 = vld [vmem:[#allocation8 + $0x50] sm:$0xff] }
  0x6a   :  { %v277_v5 = vld [vmem:[#allocation8 + $0x60] sm:$0xff]  ;;  %v771_v7 = vpack.c.bf16 %v280_v62, %v276_v61  ;;  %v279_v8 = vld [vmem:[#allocation8 + $0x70] sm:$0xff]  ;;  %v448_v10 = vld [vmem:[#allocation10 + $0x88] sm:$0xff] }
  0x6b   :  { %742 = vmatpush1.bf16.msra.mxu0 %v741_v50  ;;  %v447_v9 = vld [vmem:[#allocation10 + $0x80] sm:$0xff]  ;;  %v480_v12 = vld [vmem:[#allocation10 + $0x188] sm:$0xff]  ;;  %v765_v13 = vpack.c.bf16 %v277_v5, %v273_v4  ;;  %v773_v14 = vpack.c.bf16 %v279_v8, %v275_v6  ;;  %v449_v21 = vld [vmem:[#allocation10 + $0x90] sm:$0xff] }
  0x6c   :  { %758 = vmatpush1.bf16.msra.mxu1 %v757_v52  ;;  %760 = vmatprep.subr.bf16.mxu0 %v759_v53  ;;  %v479_v11 = vld [vmem:[#allocation10 + $0x180] sm:$0xff]  ;;  %v775_v15 = vpack.c.bf16 %v448_v10, %v447_v9  ;;  %v432_v17 = vld [vmem:[#allocation10 + $0x8] sm:$0xff]  ;;  %v450_v22 = vld [vmem:[#allocation10 + $0x98] sm:$0xff] }
  0x6d   :  { %768 = vmatprep.subr.bf16.mxu1 %v767_v57  ;;  %v431_v16 = vld [vmem:[#allocation10] sm:$0xff]  ;;  %v807_v19 = vpack.c.bf16 %v480_v12, %v479_v11  ;;  %v464_v20 = vld [vmem:[#allocation10 + $0x108] sm:$0xff]  ;;  %v481_v23 = vld [vmem:[#allocation10 + $0x190] sm:$0xff]  ;;  %v779_v28 = vpack.c.bf16 %v450_v22, %v449_v21 }
  0x6e   :  { %653 = vmatmul.mubr.msk.f32.vlgmr.msra.gmra.mrb[0].mxu0 %vm118_vm0, %v85_v63  ;;  %v463_v18 = vld [vmem:[#allocation10 + $0x100] sm:$0xff]  ;;  %v482_v24 = vld [vmem:[#allocation10 + $0x198] sm:$0xff]  ;;  %v777_v26 = vpack.c.bf16 %v432_v17, %v431_v16  ;;  %v433_v29 = vld [vmem:[#allocation10 + $0x10] sm:$0xff] }
  0x6f   :  { %654 = vmatmul.mubr.msk.f32.vlgmr.msra.gmra.mrb[0].mxu1 %vm118_vm0, %v85_v63  ;;  %762 = vmatpush1.bf16.msra.mxu0 %v761_v1  ;;  %v264_v25 = vld [vmem:[#allocation5] sm:$0xff]  ;;  %v809_v27 = vpack.c.bf16 %v464_v20, %v463_v18  ;;  %v465_v31 = vld [vmem:[#allocation10 + $0x110] sm:$0xff]  ;;  %v811_v32 = vpack.c.bf16 %v482_v24, %v481_v23  ;;  %v451_v34 = vld [vmem:[#allocation10 + $0xa0] sm:$0xff] }
  0x70   :  { %770 = vmatpush1.bf16.msra.mxu1 %v769_v2  ;;  %764 = vmatprep.subr.bf16.mxu0 %v763_v3  ;;  %v434_v30 = vld [vmem:[#allocation10 + $0x18] sm:$0xff]  ;;  %v452_v35 = vld [vmem:[#allocation10 + $0xa8] sm:$0xff]  ;;  %v435_v40 = vld [vmem:[#allocation10 + $0x20] sm:$0xff] }
  0x71   :  { %772 = vmatprep.subr.bf16.mxu1 %v771_v7  ;;  %349 = vmatprep.mubr.f32.mxu0 %v999_v0  ;;  %v466_v33 = vld [vmem:[#allocation10 + $0x118] sm:$0xff]  ;;  %v484_v36 = vld [vmem:[#allocation10 + $0x1a8] sm:$0xff]  ;;  %v781_v37 = vpack.c.bf16 %v434_v30, %v433_v29  ;;  %v783_v39 = vpack.c.bf16 %v452_v35, %v451_v34  ;;  %v467_v42 = vld [vmem:[#allocation10 + $0x120] sm:$0xff] }
  0x72   :  { %420 = vmatprep.mubr.f32.mxu1 %v999_v0  ;;  %v483_v0 = vld [vmem:[#allocation10 + $0x1a0] sm:$0xff]  ;;  %v813_v38 = vpack.c.bf16 %v466_v33, %v465_v31  ;;  %v436_v41 = vld [vmem:[#allocation10 + $0x28] sm:$0xff]  ;;  %v453_v45 = vld [vmem:[#allocation10 + $0xb0] sm:$0xff] }
  0x73   :  { %766 = vmatpush1.bf16.msra.mxu0 %v765_v13  ;;  %v815_v43 = vpack.c.bf16 %v484_v36, %v483_v0  ;;  %v468_v44 = vld [vmem:[#allocation10 + $0x128] sm:$0xff]  ;;  %v454_v46 = vld [vmem:[#allocation10 + $0xb8] sm:$0xff]  ;;  %v485_v47 = vld [vmem:[#allocation10 + $0x1b0] sm:$0xff]  ;;  %v785_v49 = vpack.c.bf16 %v436_v41, %v435_v40 }
  0x74   :  { %774 = vmatpush1.bf16.msra.mxu1 %v773_v14  ;;  %776 = vmatprep.subr.bf16.mxu0 %v775_v15  ;;  %v486_v48 = vld [vmem:[#allocation10 + $0x1b8] sm:$0xff]  ;;  %v817_v50 = vpack.c.bf16 %v468_v44, %v467_v42  ;;  %v787_v51 = vpack.c.bf16 %v454_v46, %v453_v45  ;;  %v437_v52 = vld [vmem:[#allocation10 + $0x30] sm:$0xff]  ;;  %v455_v57 = vld [vmem:[#allocation10 + $0xc0] sm:$0xff] }
  0x75   :  { %808 = vmatprep.subr.bf16.mxu1 %v807_v19  ;;  %v438_v53 = vld [vmem:[#allocation10 + $0x38] sm:$0xff]  ;;  %v469_v54 = vld [vmem:[#allocation10 + $0x130] sm:$0xff]  ;;  %v819_v55 = vpack.c.bf16 %v486_v48, %v485_v47  ;;  %v456_v58 = vld [vmem:[#allocation10 + $0xc8] sm:$0xff] }
  0x76   :  { %655 = vmatmul.mubr.msk.f32.vlgmr.msra.gmra.mrb[2].mxu0 %vm281_vm1, %v264_v25  ;;  %v470_v56 = vld [vmem:[#allocation10 + $0x138] sm:$0xff]  ;;  %v487_v59 = vld [vmem:[#allocation10 + $0x1c0] sm:$0xff]  ;;  %v488_v60 = vld [vmem:[#allocation10 + $0x1c8] sm:$0xff]  ;;  %v789_v61 = vpack.c.bf16 %v438_v53, %v437_v52  ;;  %v791_v63 = vpack.c.bf16 %v456_v58, %v455_v57 }
  0x77   :  { %656 = vmatmul.mubr.msk.f32.vlgmr.msra.gmra.mrb[2].mxu1 %vm281_vm1, %v264_v25  ;;  %778 = vmatpush3.bf16.msra.mxu0 %v777_v26  ;;  %v821_v62 = vpack.c.bf16 %v470_v56, %v469_v54  ;;  %v439_v1 = vld [vmem:[#allocation10 + $0x40] sm:$0xff]  ;;  %v440_v2 = vld [vmem:[#allocation10 + $0x48] sm:$0xff]  ;;  %v823_v3 = vpack.c.bf16 %v488_v60, %v487_v59  ;;  %v457_v8 = vld [vmem:[#allocation10 + $0xd0] sm:$0xff] }
  0x78   :  { %810 = vmatpush3.bf16.msra.mxu1 %v809_v27  ;;  %780 = vmatprep.subr.bf16.mxu0 %v779_v28  ;;  %v471_v4 = vld [vmem:[#allocation10 + $0x140] sm:$0xff]  ;;  %v472_v5 = vld [vmem:[#allocation10 + $0x148] sm:$0xff]  ;;  %v793_v6 = vpack.c.bf16 %v440_v2, %v439_v1  ;;  %v458_v9 = vld [vmem:[#allocation10 + $0xd8] sm:$0xff] }
  0x79   :  { %812 = vmatprep.subr.bf16.mxu1 %v811_v32  ;;  %v825_v7 = vpack.c.bf16 %v472_v5, %v471_v4  ;;  %v489_v10 = vld [vmem:[#allocation10 + $0x1d0] sm:$0xff]  ;;  %v795_v11 = vpack.c.bf16 %v458_v9, %v457_v8  ;;  %v490_v12 = vld [vmem:[#allocation10 + $0x1d8] sm:$0xff]  ;;  %v459_v20 = vld [vmem:[#allocation10 + $0xe0] sm:$0xff] }
  0x7a   :  { %v441_v13 = vld [vmem:[#allocation10 + $0x50] sm:$0xff]  ;;  %v442_v14 = vld [vmem:[#allocation10 + $0x58] sm:$0xff]  ;;  %v827_v15 = vpack.c.bf16 %v490_v12, %v489_v10  ;;  %v460_v21 = vld [vmem:[#allocation10 + $0xe8] sm:$0xff] }
  0x7b   :  { %782 = vmatpush3.bf16.msra.mxu0 %v781_v37  ;;  %v797_v16 = vpack.c.bf16 %v442_v14, %v441_v13  ;;  %v473_v17 = vld [vmem:[#allocation10 + $0x150] sm:$0xff]  ;;  %v474_v18 = vld [vmem:[#allocation10 + $0x158] sm:$0xff]  ;;  %v491_v22 = vld [vmem:[#allocation10 + $0x1e0] sm:$0xff]  ;;  %v799_v23 = vpack.c.bf16 %v460_v21, %v459_v20 }
  0x7c   :  { %814 = vmatpush3.bf16.msra.mxu1 %v813_v38  ;;  %784 = vmatprep.subr.bf16.mxu0 %v783_v39  ;;  %v829_v19 = vpack.c.bf16 %v474_v18, %v473_v17  ;;  %v492_v24 = vld [vmem:[#allocation10 + $0x1e8] sm:$0xff]  ;;  %v443_v25 = vld [vmem:[#allocation10 + $0x60] sm:$0xff]  ;;  %v461_v32 = vld [vmem:[#allocation10 + $0xf0] sm:$0xff] }
  0x7d   :  { %816 = vmatprep.subr.bf16.mxu1 %v815_v43  ;;  %v444_v26 = vld [vmem:[#allocation10 + $0x68] sm:$0xff]  ;;  %v831_v27 = vpack.c.bf16 %v492_v24, %v491_v22  ;;  %v475_v29 = vld [vmem:[#allocation10 + $0x160] sm:$0xff]  ;;  %v462_v33 = vld [vmem:[#allocation10 + $0xf8] sm:$0xff] }
  0x7e   :  { %v801_v28 = vpack.c.bf16 %v444_v26, %v443_v25  ;;  %v476_v30 = vld [vmem:[#allocation10 + $0x168] sm:$0xff]  ;;  %v493_v34 = vld [vmem:[#allocation10 + $0x1f0] sm:$0xff]  ;;  %v803_v35 = vpack.c.bf16 %v462_v33, %v461_v32  ;;  %v494_v0 = vld [vmem:[#allocation10 + $0x1f8] sm:$0xff] }
  0x7f   :  { %786 = vmatpush3.bf16.msra.mxu0 %v785_v49  ;;  %v833_v31 = vpack.c.bf16 %v476_v30, %v475_v29  ;;  %v445_v36 = vld [vmem:[#allocation10 + $0x70] sm:$0xff]  ;;  %v446_v37 = vld [vmem:[#allocation10 + $0x78] sm:$0xff]  ;;  %v835_v38 = vpack.c.bf16 %v494_v0, %v493_v34 }
  0x80   :  { %818 = vmatpush3.bf16.msra.mxu1 %v817_v50  ;;  %788 = vmatprep.subr.bf16.mxu0 %v787_v51  ;;  %v805_v39 = vpack.c.bf16 %v446_v37, %v445_v36  ;;  %v477_v40 = vld [vmem:[#allocation10 + $0x170] sm:$0xff]  ;;  %v478_v41 = vld [vmem:[#allocation10 + $0x178] sm:$0xff] }
  0x81   :  { %820 = vmatprep.subr.bf16.mxu1 %v819_v55  ;;  %v837_v42 = vpack.c.bf16 %v478_v41, %v477_v40 }
  0x83   :  { %790 = vmatpush3.bf16.msra.mxu0 %v789_v61 }
  0x84   :  { %822 = vmatpush3.bf16.msra.mxu1 %v821_v62  ;;  %792 = vmatprep.subr.bf16.mxu0 %v791_v63 }
  0x85   :  { %824 = vmatprep.subr.bf16.mxu1 %v823_v3 }
  0x87   :  { %794 = vmatpush3.bf16.msra.mxu0 %v793_v6 }
  0x88   :  { %826 = vmatpush3.bf16.msra.mxu1 %v825_v7  ;;  %796 = vmatprep.subr.bf16.mxu0 %v795_v11 }
  0x89   :  { %828 = vmatprep.subr.bf16.mxu1 %v827_v15 }
  0x8b   :  { %798 = vmatpush3.bf16.msra.mxu0 %v797_v16 }
  0x8c   :  { %830 = vmatpush3.bf16.msra.mxu1 %v829_v19  ;;  %800 = vmatprep.subr.bf16.mxu0 %v799_v23 }
  0x8d   :  { %832 = vmatprep.subr.bf16.mxu1 %v831_v27 }
  0x8f   :  { %802 = vmatpush3.bf16.msra.mxu0 %v801_v28 }
  0x90   :  { %834 = vmatpush3.bf16.msra.mxu1 %v833_v31  ;;  %804 = vmatprep.subr.bf16.mxu0 %v803_v35 }
  0x91   :  { %836 = vmatprep.subr.bf16.mxu1 %v835_v38 }
  0x93   :  { %806 = vmatpush3.bf16.msra.mxu0 %v805_v39 }
  0x94   :  { %838 = vmatpush3.bf16.msra.mxu1 %v837_v42 }
 0x141   :  { %v188_v43 = vpop.f32.mrb[0].mxu0 }
 0x142   :  { %v259_v44 = vpop.f32.mrb[0].mxu1  ;;  %v190_v45 = vpop.f32.mrb[1].mxu0 }
 0x143   :  { %v261_v46 = vpop.f32.mrb[1].mxu1 }
 0x149   :  { %v351_v47 = vpop.f32.mrb[2].mxu0 }
 0x14a   :  { %v427_v48 = vmul.f32 %v351_v47, %v188_v43  ;;  %v422_v49 = vpop.f32.mrb[2].mxu1  ;;  %v353_v50 = vpop.f32.mrb[3].mxu0 }
 0x14b   :  { %v429_v51 = vmul.f32 %v422_v49, %v259_v44  ;;  %v428_v52 = vmul.f32 %v353_v50, %v190_v45  ;;  %v424_v53 = vpop.f32.mrb[3].mxu1 }
 0x14c   :  { %v430_v54 = vmul.f32 %v424_v53, %v261_v46 }
 0x14d   :  { %559 = vmatprep.mubr.f32.mxu0 %v428_v52 }
 0x14e   :  { %629 = vmatprep.mubr.f32.mxu1 %v430_v54  ;;  %560 = vmatmul.mubr.f32.vlgmr.msra.gmra.mrb[4].mxu0 %v427_v48 }
 0x14f   :  { %630 = vmatmul.mubr.f32.vlgmr.msra.gmra.mrb[4].mxu1 %v429_v51 }
 0x221   :  { %v689_v55 = vpop.f32.mrb[4].mxu0 }
 0x222   :  { %v724_v56 = vpop.f32.mrb[4].mxu1  ;;  %v690_v57 = vpop.f32.mrb[5].mxu0 }
 0x223   :  { %v691_v58 = vadd.f32 %v690_v57, %v689_v55  ;;  %v725_v59 = vpop.f32.mrb[5].mxu1 }
 0x224   :  { %v726_v60 = vadd.f32 %v725_v59, %v724_v56 }
 0x226   :  { %v632_v61 = vadd.f32 %v726_v60, %v691_v58 }
 0x228   :  { %635 = vst [vmem:[#allocation11] sm:$0xff] %v632_v61 }
 0x229   :  { %971 = shalt.err (!%p968_p2)
}
 0x22a   :  { %s972_s30 = scalar_lea.hbm %s1122_s5, 128 }
 0x22b   :  { %p973_p3 = scmp.ne.s32.totalorder %s1122_s5, %s972_s30  ;;  %p976_p4 = scmp.lt.u32.totalorder %s972_s30, %s1122_s5 }
 0x22d   :  { %p978_p5 = pnand %p976_p4, %p973_p3 }
 0x22f   :  { %981 = shalt.err (!%p978_p5)
}
 0x230   :  { %645 = dma.vmem_to_hbm [thread:$0]  %s643_s27, 128, %s1122_s5, [#allocation4]  }
 0x231   :  { %988 = dma.done.wait [#allocation4], 128  }
 0x232   :  { %989 = vsyncadd [#allocation4], 4294967168 }
 0x233   :  { %649 = vsyncpa [#allocation3], 1 }
 0x234   :  { %650 = vsyncpa [#allocation6], 1 }
 0x235   :  { %651 = vsyncpa [#allocation9], 1 }
 0x236   :  { %652 = vsyncpa [#allocation4], 1 }

</bundles_post_ra>
